<compile_context>
chip_gen: v6e
topology: v6e:2x2x1
jax: 0.10.0
libtpu: 0.0.40
codegen_flags: <defaults>
</compile_context>

<pallas_src>
import functools
import math

import jax
import jax.numpy as jnp
from jax.experimental import pallas as pl
from jax.experimental.pallas import tpu as pltpu


def _cmlp_kernel(x_ref, w1_ref, b1_ref, w2_ref, b2_ref, o_ref, *,
                 approximate_gelu=True):
    # x_ref:  (Cin, TM)    pixels of one image, channels on sublanes
    # w1_ref: (Hid, Cin)   fc1 weight (PyTorch Conv2d layout, 1x1 squeezed)
    # b1_ref: (Hid, 1)
    # w2_ref: (Cout, Hid)  fc2 weight
    # b2_ref: (Cout, 1)
    # o_ref:  (Cout, TM)
    #
    # Feed native dtypes (bf16/f32) straight to the MXU; f32 accumulate.
    h = jnp.dot(w1_ref[...], x_ref[...], preferred_element_type=jnp.float32)
    h = h + b1_ref[...].astype(jnp.float32)

    if approximate_gelu:
        # tanh GELU routes the transcendental to the EUP slot (VPU stays
        # free). Tiny numerical deviation from torch.nn.GELU()'s exact erf.
        h = jax.nn.gelu(h, approximate=True)
    else:
        h = 0.5 * h * (1.0 + jax.lax.erf(h * (1.0 / math.sqrt(2.0))))

    # TODO(synk): nn.Dropout(drop=0.0) is identity in eval / with p=0; not emitted.

    o = jnp.dot(w2_ref[...], h.astype(w2_ref.dtype),
                preferred_element_type=jnp.float32)
    o = o + b2_ref[...].astype(jnp.float32)
    o_ref[...] = o.astype(o_ref.dtype)


def _pick_tile_cols(M, Cin, Hid, Cout, x_bytes, w_bytes, out_bytes,
                    vmem_budget_bytes):
    """Largest pixel tile (multiple of 128) whose working set fits the budget."""
    # Resident weights/biases (assume double-buffered to be conservative).
    weight_bytes = 2 * (Hid * Cin + Cout * Hid + Hid + Cout) * w_bytes
    avail = max(vmem_budget_bytes - weight_bytes, 0)
    # Per pixel column: double-buffered x & out blocks + f32 intermediates.
    per_col = 2 * Cin * x_bytes + 2 * Cout * out_bytes + (Hid + Cout) * 4
    max_cols = (avail // per_col) // 128 * 128
    tile = int(min(max(max_cols, 128), 2048))
    # No point tiling wider than the (lane-rounded) spatial extent.
    tile = min(tile, pl.cdiv(M, 128) * 128)
    return int(tile)


def cmlp_forward(x_nchw, w1, b1, w2, b2, *, tile_cols=None, exact_gelu=False,
                 vmem_budget_bytes=48 * 1024 * 1024):
    """x_nchw: (N, Cin, H, W); w1: (Hid, Cin); b1: (Hid,); w2: (Cout, Hid); b2: (Cout,)."""
    N, Cin, H, W = x_nchw.shape
    Hid = w1.shape[0]
    Cout = w2.shape[0]
    M = H * W

    if tile_cols is None:
        itemsize = jnp.dtype(x_nchw.dtype).itemsize
        tile_cols = _pick_tile_cols(M, Cin, Hid, Cout,
                                    itemsize, jnp.dtype(w1.dtype).itemsize,
                                    itemsize, vmem_budget_bytes)

    # NCHW -> (N, Cin, H*W): contiguous reshape, no HBM transpose.
    x3d = x_nchw.reshape(N, Cin, M)

    M_pad = pl.cdiv(M, tile_cols) * tile_cols
    if M_pad != M:
        # Rare (only when H*W is not a multiple of the tile); padded pixels
        # compute garbage and are sliced off below.
        x3d = jnp.pad(x3d, ((0, 0), (0, 0), (0, M_pad - M)))

    b1_2d = b1.reshape(Hid, 1)
    b2_2d = b2.reshape(Cout, 1)

    grid = (N, M_pad // tile_cols)

    kernel = functools.partial(_cmlp_kernel, approximate_gelu=not exact_gelu)

    # NOTE: weight/bias blocks use constant index maps; at real CMlp sizes it
    # can pay to single-buffer them to halve their VMEM footprint -- left at
    # the default pipelining here for portability across jax versions.
    out3d = pl.pallas_call(
        kernel,
        out_shape=jax.ShapeDtypeStruct((N, Cout, M_pad), x_nchw.dtype),
        grid_spec=pltpu.PrefetchScalarGridSpec(
            num_scalar_prefetch=0,
            grid=grid,
            in_specs=[
                pl.BlockSpec((None, Cin, tile_cols), lambda n, t: (n, 0, t)),
                pl.BlockSpec((Hid, Cin), lambda n, t: (0, 0)),
                pl.BlockSpec((Hid, 1), lambda n, t: (0, 0)),
                pl.BlockSpec((Cout, Hid), lambda n, t: (0, 0)),
                pl.BlockSpec((Cout, 1), lambda n, t: (0, 0)),
            ],
            out_specs=pl.BlockSpec((None, Cout, tile_cols),
                                   lambda n, t: (n, 0, t)),
        ),
        compiler_params=pltpu.CompilerParams(
            dimension_semantics=("parallel", "parallel"),
            vmem_limit_bytes=vmem_budget_bytes,   # < 64 MiB: safe on v7x too
        ),
    )(x3d, w1, b1_2d, w2, b2_2d)

    if M_pad != M:
        out3d = out3d[:, :, :M]
    # (N, Cout, H*W) -> NCHW: contiguous reshape, no transpose.
    return out3d.reshape(N, Cout, H, W)


def _init_params(key, in_features, hidden_features, out_features,
                 dtype=jnp.float32):
    """Deterministic init mimicking Conv2d(k=1) fan-in-uniform init."""
    k1, k2, k3, k4 = jax.random.split(key, 4)
    bound1 = 1.0 / math.sqrt(in_features)
    bound2 = 1.0 / math.sqrt(hidden_features)
    # Weights kept in PyTorch Conv2d layout with the 1x1 squeezed: (out_ch, in_ch).
    w1 = jax.random.uniform(k1, (hidden_features, in_features), dtype,
                            minval=-bound1, maxval=bound1)
    b1 = jax.random.uniform(k2, (hidden_features,), dtype,
                            minval=-bound1, maxval=bound1)
    w2 = jax.random.uniform(k3, (out_features, hidden_features), dtype,
                            minval=-bound2, maxval=bound2)
    b2 = jax.random.uniform(k4, (out_features,), dtype,
                            minval=-bound2, maxval=bound2)
    return w1, b1, w2, b2


if __name__ == "__main__":
    key = jax.random.PRNGKey(0)
    kx, kp = jax.random.split(key)

    # CMlp(in_features=4, hidden_features=32, out_features=4)
    N, Cin, H, W = 2, 4, 16, 16
    Hid, Cout = 32, 4

    x = jax.random.normal(kx, (N, Cin, H, W), jnp.float32)
    w1, b1, w2, b2 = _init_params(kp, Cin, Hid, Cout)

    out = cmlp_forward(x, w1, b1, w2, b2)
    out = jax.block_until_ready(out)

    # Reference in plain JAX (same per-pixel MLP semantics; tanh GELU matches
    # the kernel's default approximate_gelu=True).
    x3d = x.reshape(N, Cin, H * W)
    h = jnp.einsum("hc,ncm->nhm", w1, x3d) + b1[None, :, None]
    h = jax.nn.gelu(h, approximate=True)
    ref = jnp.einsum("oh,nhm->nom", w2, h) + b2[None, :, None]
    ref = ref.reshape(N, Cout, H, W)

    assert out.shape == (N, Cout, H, W)
    assert jnp.allclose(out, ref, atol=1e-5, rtol=1e-5)

    print("KERNEL_OK")
</pallas_src>

<mosaic_0001>
module attributes {stable_mosaic.version = 11 : i64} {
  func.func @_cmlp_kernel(%arg0: i32, %arg1: i32, %arg2: memref<1x4x256xf32, #tpu.memory_space<vmem>>, %arg3: memref<32x4xf32, #tpu.memory_space<vmem>>, %arg4: memref<32x1xf32, #tpu.memory_space<vmem>>, %arg5: memref<4x32xf32, #tpu.memory_space<vmem>>, %arg6: memref<4x1xf32, #tpu.memory_space<vmem>>, %arg7: memref<1x4x256xf32, #tpu.memory_space<vmem>>) attributes {dimension_semantics = [#tpu.dimension_semantics<parallel>, #tpu.dimension_semantics<parallel>], iteration_bounds = array<i64: 2, 1>, scalar_prefetch = 0 : i64, scratch_operands = 0 : i64, tpu.core_type = #tpu.core_type<tc>, window_params = [{transform_indices = @transform_0, window_bounds = array<i64: 1, 4, 256>}, {pipeline_mode = #tpu.pipeline_mode<synchronous>, transform_indices = @transform_1, window_bounds = array<i64: 32, 4>}, {pipeline_mode = #tpu.pipeline_mode<synchronous>, transform_indices = @transform_2, window_bounds = array<i64: 32, 1>}, {pipeline_mode = #tpu.pipeline_mode<synchronous>, transform_indices = @transform_3, window_bounds = array<i64: 4, 32>}, {pipeline_mode = #tpu.pipeline_mode<synchronous>, transform_indices = @transform_4, window_bounds = array<i64: 4, 1>}, {transform_indices = @transform_5, window_bounds = array<i64: 1, 4, 256>}]} {
    %c0 = arith.constant 0 : index
    %c0_0 = arith.constant 0 : index
    %0 = vector.load %arg3[%c0, %c0_0] : memref<32x4xf32, #tpu.memory_space<vmem>>, vector<32x4xf32>
    %c0_1 = arith.constant 0 : index
    %c0_2 = arith.constant 0 : index
    %c0_3 = arith.constant 0 : index
    %1 = vector.load %arg2[%c0_1, %c0_2, %c0_3] : memref<1x4x256xf32, #tpu.memory_space<vmem>>, vector<1x4x256xf32>
    %2 = vector.shape_cast %1 : vector<1x4x256xf32> to vector<4x256xf32>
    %cst = arith.constant dense<0.000000e+00> : vector<32x256xf32>
    %3 = tpu.matmul %0, %2, %cst {dimension_numbers = #tpu.dot_dimension_numbers<[1], [0], [0], [1], [0, 0, 1, 1], [], []>} : vector<32x4xf32>, vector<4x256xf32>, vector<32x256xf32> -> vector<32x256xf32>
    %c0_4 = arith.constant 0 : index
    %c0_5 = arith.constant 0 : index
    %4 = vector.load %arg4[%c0_4, %c0_5] : memref<32x1xf32, #tpu.memory_space<vmem>>, vector<32x1xf32>
    %5 = vector.broadcast %4 : vector<32x1xf32> to vector<32x256xf32>
    %6 = arith.addf %3, %5 : vector<32x256xf32>
    %7 = arith.mulf %6, %6 : vector<32x256xf32>
    %8 = arith.mulf %6, %7 : vector<32x256xf32>
    %cst_6 = arith.constant 4.471500e-02 : f32
    %9 = vector.broadcast %cst_6 : f32 to vector<32x256xf32>
    %10 = arith.mulf %9, %8 : vector<32x256xf32>
    %11 = arith.addf %6, %10 : vector<32x256xf32>
    %cst_7 = arith.constant 0.797884583 : f32
    %12 = vector.broadcast %cst_7 : f32 to vector<32x256xf32>
    %13 = arith.mulf %12, %11 : vector<32x256xf32>
    %14 = math.tanh %13 : vector<32x256xf32>
    %cst_8 = arith.constant 1.000000e+00 : f32
    %15 = vector.broadcast %cst_8 : f32 to vector<32x256xf32>
    %16 = arith.addf %15, %14 : vector<32x256xf32>
    %cst_9 = arith.constant 5.000000e-01 : f32
    %17 = vector.broadcast %cst_9 : f32 to vector<32x256xf32>
    %18 = arith.mulf %17, %16 : vector<32x256xf32>
    %19 = arith.mulf %6, %18 : vector<32x256xf32>
    %c0_10 = arith.constant 0 : index
    %c0_11 = arith.constant 0 : index
    %20 = vector.load %arg5[%c0_10, %c0_11] : memref<4x32xf32, #tpu.memory_space<vmem>>, vector<4x32xf32>
    %cst_12 = arith.constant dense<0.000000e+00> : vector<4x256xf32>
    %21 = tpu.matmul %20, %19, %cst_12 {dimension_numbers = #tpu.dot_dimension_numbers<[1], [0], [0], [1], [0, 0, 1, 1], [], []>} : vector<4x32xf32>, vector<32x256xf32>, vector<4x256xf32> -> vector<4x256xf32>
    %c0_13 = arith.constant 0 : index
    %c0_14 = arith.constant 0 : index
    %22 = vector.load %arg6[%c0_13, %c0_14] : memref<4x1xf32, #tpu.memory_space<vmem>>, vector<4x1xf32>
    %23 = vector.broadcast %22 : vector<4x1xf32> to vector<4x256xf32>
    %24 = arith.addf %21, %23 : vector<4x256xf32>
    %c0_15 = arith.constant 0 : index
    %c0_16 = arith.constant 0 : index
    %c0_17 = arith.constant 0 : index
    %25 = vector.load %arg7[%c0_15, %c0_16, %c0_17] : memref<1x4x256xf32, #tpu.memory_space<vmem>>, vector<1x4x256xf32>
    %26 = vector.shape_cast %25 : vector<1x4x256xf32> to vector<4x256xf32>
    %27 = vector.shape_cast %24 : vector<4x256xf32> to vector<1x4x256xf32>
    tpu.vector_store %arg7[%c0_15, %c0_16, %c0_17], %27 {strides = array<i32>} : memref<1x4x256xf32, #tpu.memory_space<vmem>>, vector<1x4x256xf32>,
    return
  }
  func.func @transform_0(%arg0: i32, %arg1: i32) -> (i32, i32, i32) {
    %c0_i32 = arith.constant 0 : i32
    %c0_i32_0 = arith.constant 0 : i32
    return %arg0, %c0_i32, %arg1 : i32, i32, i32
  }
  func.func @transform_1(%arg0: i32, %arg1: i32) -> (i32, i32) {
    %c0_i32 = arith.constant 0 : i32
    %c0_i32_0 = arith.constant 0 : i32
    %c0_i32_1 = arith.constant 0 : i32
    return %c0_i32, %c0_i32_0 : i32, i32
  }
  func.func @transform_2(%arg0: i32, %arg1: i32) -> (i32, i32) {
    %c0_i32 = arith.constant 0 : i32
    %c0_i32_0 = arith.constant 0 : i32
    %c0_i32_1 = arith.constant 0 : i32
    return %c0_i32, %c0_i32_0 : i32, i32
  }
  func.func @transform_3(%arg0: i32, %arg1: i32) -> (i32, i32) {
    %c0_i32 = arith.constant 0 : i32
    %c0_i32_0 = arith.constant 0 : i32
    %c0_i32_1 = arith.constant 0 : i32
    return %c0_i32, %c0_i32_0 : i32, i32
  }
  func.func @transform_4(%arg0: i32, %arg1: i32) -> (i32, i32) {
    %c0_i32 = arith.constant 0 : i32
    %c0_i32_0 = arith.constant 0 : i32
    %c0_i32_1 = arith.constant 0 : i32
    return %c0_i32, %c0_i32_0 : i32, i32
  }
  func.func @transform_5(%arg0: i32, %arg1: i32) -> (i32, i32, i32) {
    %c0_i32 = arith.constant 0 : i32
    %c0_i32_0 = arith.constant 0 : i32
    return %arg0, %c0_i32, %arg1 : i32, i32, i32
  }
}

</mosaic_0001>

<bundles_post_ra>
// kernel: tpu_custom_call.1
= control target key start
LH: loop header
LB: loop body
LE: loop exit
PB: predicated region body
PF: predicated region fallthrough
CT: control target
= control target key end

     0   :  { %10 = vsyncpa [#allocation3], 0  ;;  %s1024_s0 = inlined_call_operand.vmem [shape: f32[2,4,256], index: 0, kind: input, shape index: {}]   ;;  %s1025_s1 = inlined_call_operand.vmem [shape: f32[32,4], index: 1, kind: input, shape index: {}]   ;;  %s1026_s2 = inlined_call_operand.vmem [shape: f32[32,1], index: 2, kind: input, shape index: {}]   ;;  %s1027_s3 = inlined_call_operand.vmem [shape: f32[4,32], index: 3, kind: input, shape index: {}]   ;;  %s1028_s4 = inlined_call_operand.vmem [shape: f32[4,1], index: 4, kind: input, shape index: {}]   ;;  %s1029_s5 = inlined_call_operand.hbm [shape: f32[2,4,256], index: 5, kind: output, shape index: {}]  }
   0x1   :  { %12 = vsyncpa [#allocation3 + $0x1], 0  ;;  %s853_s18 = smov 0   ;;  %s855_s19 = smov 0  }
   0x2   :  { %s857_s20 = smov 0   ;;  %s859_s21 = smov 0  }
   0x3   :  { %s861_s22 = smov 0   ;;  %s863_s23 = smov 0  }
   0x4 LB: > { %s644_s24 = sadd.s32 4294967295, %s818_s23   ;;  %s645_s25 = sadd.s32 4294967294, %s818_s23   ;;  %s818_s23 = sphi %s863_s23, %s18_s23   ;;  %s814_s22 = sphi %s861_s22, %s1036_s22   ;;  %s810_s21 = sphi %s859_s21, %s1035_s21   ;;  %s806_s20 = sphi %s857_s20, %s1034_s20   ;;  %s802_s19 = sphi %s855_s19, %s1033_s19   ;;  %s798_s18 = sphi %s853_s18, %s1032_s18  }
   0x5   : > { %s30_s26 = sadd.s32 1, %s814_s22  ;;  %s151_s27 = sadd.s32 1, %s806_s20 }
   0x6   : > { %p32_p0 = scmp.ge.s32.totalorder %s30_s26, 2  ;;  %p161_p1 = scmp.ne.s32.totalorder %s806_s20, %s802_s19 }
   0x7   : > { %p162_p2 = scmp.eq.s32.totalorder %s644_s24, 1  ;;  %p167_p3 = scmp.ne.s32.totalorder %s802_s19, %s798_s18 }
   0x8   : > { %s1038_s26 = smov (%p32_p0, %s30_s26), 0  ;;  %p168_p5 = scmp.eq.s32.totalorder %s645_s25, 1 }
   0x9   : > { %p893_p4 = por %p162_p2, %p161_p1  ;;  %s146_s29 = ssub.s32 %s814_s22, %s1038_s26 }
   0xa   : > { %p648_p6 = scmp.ge.s32.totalorder %s818_s23, 1  ;;  %p149_p7 = scmp.eq.s32.totalorder %s146_s29, 0 }
   0xb   : > { %p900_p8 = por %p168_p5, %p167_p3  ;;  %p211_p9 = scmp.lt.s32.totalorder %s818_s23, 3 }
   0xc   : > { %s906_s6 = scalar_select %p149_p7, %s806_s20, %s151_s27  }
   0xd   : > { %p212_p10 = pnand %p648_p6, %p211_p9 }
   0xe   : > { %p244_p11 = scmp.lt.s32.totalorder (!%p212_p10), %s810_s21, 1  ;;  %s240_s17 = sand.u32 (!%p212_p10), 1, %s802_s19  }
   0xf   : > { %215 = sbr.rel (%p212_p10) target bundleno = 489 (0x1e9), region = 40  ;;  %s649_s24 = sshll.u32 (!%p212_p10), %s240_s17, 3 }
  0x10   : > { %s242_s27 = scalar_lea.vmem (!%p212_p10), [#allocation2], %s649_s24  ;;  %s552_s10 = scalar_lea.sflag (!%p212_p10), [#allocation3], %s240_s17 }
  0x11   : > { %s568_s29 = sshll.u32 (!%p212_p10), %s242_s27, 4  ;;  %s569_s29 = int_to_ptr.vmem [resolvable:$true] %s568_s29 }
  0x12   : > { %s742_s11 = scalar_lea.vmem (!%p212_p10), %s569_s29, 128 }
  0x13   : > { %p743_p12 = scmp.ne.s32.totalorder (!%p212_p10), %s569_s29, %s742_s11 }
  0x14   : > { %v820_v0 = vmov 0.0   ;;  %v260_v1 = vld [vmem:[%s1026_s2 + $0x8] sm:$0xff]  ;;  %s245_s9 = scalar_select %p244_p11, %s810_s21, 1  ;;  %v821_v2 = vmov 0   ;;  %v262_v3 = vld [vmem:[%s1026_s2 + $0x18] sm:$0xff]  ;;  %v259_v4 = vld [vmem:[%s1026_s2] sm:$0xff] }
  0x15   : > { %367 = vmatprep.mubr.f32.mxu0 %v820_v0  ;;  %539 = vmatprep.mubr.f32.mxu1 %v820_v0  ;;  %v261_v5 = vld [vmem:[%s1026_s2 + $0x10] sm:$0xff]  ;;  %vm298_vm0 = vcmask 1043456   ;;  %v254_v8 = vld [vmem:[%s1025_s1] sm:$0xff]  ;;  %vm285_vm1 = vcmask 31744   ;;  %v255_v10 = vld [vmem:[%s1025_s1 + $0x8] sm:$0xff]  ;;  %vm471_vm2 = vcmask 261120   ;;  %p744_p13 = pnand %p743_p12, %p893_p4 }
  0x16   : > { %724 = vset.pattern.permute.xlu1 %v821_v2  ;;  %723 = vset.pattern.permute.xlu0 %v821_v2  ;;  %s664_s12 = sshll.u32 %s245_s9, 3  ;;  %v465_v9 = vld [vmem:[%s1028_s4] sm:$0xf]  ;;  %v256_v11 = vld [vmem:[%s1025_s1 + $0x10] sm:$0xff]  ;;  %v257_v12 = vld [vmem:[%s1025_s1 + $0x18] sm:$0xff] }
  0x17   : > { %270 = vperm.xlu1 %724, %v260_v1   ;;  %280 = vperm.xlu0 %723, %v262_v3   ;;  %s251_s25 = scalar_lea.vmem %s1024_s0, %s664_s12  ;;  %p745_p0 = pneg %p744_p13 }
  0x18   : > { %v258_v6 = vld [vmem:[%s251_s25] sm:$0xff]  ;;  %s665_s25 = sshll.u32 %s810_s21, 7  ;;  %s822_s12 = smov [#allocation2]  }
  0x19   : > { %v284_v7 = vcombine.high %v258_v6, %v258_v6  ;;  %s566_s9 = scalar_lea.hbm %s1029_s5, %s665_s25  ;;  %s746_s13 = sshll.u32 %s822_s12, 4  ;;  %s747_s13 = int_to_ptr.vmem [resolvable:$false] %s746_s13 }
  0x1a   : > { %s748_s21 = scalar_lea.vmem %s747_s13, 256  ;;  %p749_p1 = scmp.lt.s32.totalorder %s569_s29, %s747_s13 }
  0x1b   : > { %265 = vperm.xlu1 %724, %v259_v4   ;;  %275 = vperm.xlu0 %723, %v261_v5   ;;  %p750_p2 = scmp.lt.s32.totalorder %s748_s21, %s742_s11 }
  0x1c   : > { %652 = vmatprep.subr.msk.mxu0 %vm298_vm0, %v284_v7 }
  0x1d   : > { %653 = vmatpush1.msk.msra.mxu0 %vm298_vm0, %v258_v6  ;;  %p751_p3 = por %p750_p2, %p749_p1 }
  0x1e   : > { %654 = vmatmul.mubr.msk.f32.vlgmr.msra.gmra.mxu0 %vm285_vm1, %v254_v8 }
  0x1f   : > { %468 = vperm.xlu0 %723, %v465_v9   ;;  %373 = vmatprep.mubr.f32.mxu0 %v820_v0  ;;  %p752_p5 = pnand %p751_p3, %p745_p0 }
  0x22   : > { %655 = vmatmul.mubr.msk.f32.gmra.mxu0 %vm285_vm1, %v255_v10 }
  0x23   : > { %379 = vmatprep.mubr.f32.mxu0 %v820_v0 }
  0x26   : > { %656 = vmatmul.mubr.msk.f32.gmra.mxu0 %vm285_vm1, %v256_v11 }
  0x27   : > { %385 = vmatprep.mubr.f32.mxu0 %v820_v0 }
  0x2a   : > { %657 = vmatmul.mubr.msk.f32.gmra.mxu0 %vm285_vm1, %v257_v12 }
  0x92   : > { %v271_v13 = vpop.permute.xlu1 %270  ;;  %v281_v16 = vpop.permute.xlu0 %280 }
  0x96   : > { %v266_v15 = vpop.permute.xlu1 %265  ;;  %v276_v27 = vpop.permute.xlu0 %275 }
  0xde   : > { %v369_v14 = vpop.f32.mrf.mxu0 }
  0xdf   : > { %v942_v19 = vadd.f32 %v369_v14, %v266_v15 }
  0xe0   : > { %v371_v17 = vpop.f32.mrf.mxu0 }
  0xe1   : > { %v940_v18 = vadd.f32 %v371_v17, %v266_v15  ;;  %v392_v28 = vmul.f32 %v942_v19, %v942_v19 }
  0xe2   : > { %v375_v20 = vpop.f32.mrf.mxu0 }
  0xe3   : > { %v393_v21 = vmul.f32 %v940_v18, %v940_v18  ;;  %v946_v22 = vadd.f32 %v375_v20, %v271_v13  ;;  %v400_v37 = vmul.f32 %v392_v28, %v942_v19 }
  0xe4   : > { %v377_v23 = vpop.f32.mrf.mxu0 }
  0xe5   : > { %v401_v24 = vmul.f32 %v393_v21, %v940_v18  ;;  %v394_v25 = vmul.f32 %v946_v22, %v946_v22  ;;  %v951_v26 = vadd.f32 %v377_v23, %v271_v13  ;;  %v408_v49 = vmul.f32 0.044715, %v400_v37 }
  0xe6   : > { %v381_v29 = vpop.f32.mrf.mxu0 }
  0xe7   : > { %v409_v30 = vmul.f32 0.044715, %v401_v24  ;;  %v402_v31 = vmul.f32 %v394_v25, %v946_v22  ;;  %v395_v32 = vmul.f32 %v951_v26, %v951_v26  ;;  %v958_v33 = vadd.f32 %v381_v29, %v276_v27 }
  0xe8   : > { %v383_v34 = vpop.f32.mrf.mxu0  ;;  %v416_v61 = vadd.f32 %v408_v49, %v942_v19 }
  0xe9   : > { %v410_v35 = vmul.f32 0.044715, %v402_v31  ;;  %v403_v36 = vmul.f32 %v395_v32, %v951_v26  ;;  %v396_v38 = vmul.f32 %v958_v33, %v958_v33  ;;  %v964_v39 = vadd.f32 %v383_v34, %v276_v27 }
  0xea   : > { %v387_v40 = vpop.f32.mrf.mxu0  ;;  %v417_v41 = vadd.f32 %v409_v30, %v940_v18  ;;  %v424_v6 = vmul.f32 0.7978846, %v416_v61 }
  0xeb   : > { %v411_v42 = vmul.f32 0.044715, %v403_v36  ;;  %v418_v43 = vadd.f32 %v410_v35, %v946_v22  ;;  %v404_v44 = vmul.f32 %v396_v38, %v958_v33  ;;  %v397_v45 = vmul.f32 %v964_v39, %v964_v39 }
  0xec   : > { %v388_v46 = vadd.f32 %v387_v40, %v281_v16  ;;  %v389_v47 = vpop.f32.mrf.mxu0  ;;  %v425_v53 = vmul.f32 0.7978846, %v417_v41 }
  0xed   : > { %v390_v48 = vadd.f32 %v389_v47, %v281_v16  ;;  %v412_v50 = vmul.f32 0.044715, %v404_v44  ;;  %v405_v51 = vmul.f32 %v397_v45, %v964_v39  ;;  %v419_v54 = vadd.f32 %v411_v42, %v951_v26 }
  0xee   : > { %v398_v52 = vmul.f32 %v388_v46, %v388_v46  ;;  %v426_v56 = vmul.f32 0.7978846, %v418_v43  ;;  %726 = vtanh.f32 %v425_v53 }
  0xef   : > { %v399_v55 = vmul.f32 %v390_v48, %v390_v48  ;;  %v420_v57 = vadd.f32 %v412_v50, %v958_v33  ;;  %v413_v58 = vmul.f32 0.044715, %v405_v51  ;;  %v427_v1 = vmul.f32 0.7978846, %v419_v54 }
  0xf0   : > { %v406_v59 = vmul.f32 %v398_v52, %v388_v46  ;;  %728 = vtanh.f32 %v426_v56 }
  0xf1   : > { %v407_v60 = vmul.f32 %v399_v55, %v390_v48  ;;  %v428_v62 = vmul.f32 0.7978846, %v420_v57  ;;  %v421_v63 = vadd.f32 %v413_v58, %v964_v39 }
  0xf2   : > { %v414_v0 = vmul.f32 0.044715, %v406_v59 }
  0xf3   : > { %v415_v2 = vmul.f32 0.044715, %v407_v60  ;;  %v429_v3 = vmul.f32 0.7978846, %v421_v63  ;;  %730 = vtanh.f32 %v428_v62 }
  0xf4   : > { %v422_v4 = vadd.f32 %v414_v0, %v388_v46 }
  0xf5   : > { %v423_v5 = vadd.f32 %v415_v2, %v390_v48  ;;  %732 = vtanh.f32 %v429_v3 }
  0xf6   : > { %v430_v7 = vmul.f32 0.7978846, %v422_v4  ;;  %734 = vtanh.f32 %v427_v1 }
  0xf7   : > { %v431_v8 = vmul.f32 0.7978846, %v423_v5 }
  0xf8   : > { %736 = vtanh.f32 %v430_v7 }
  0xf9   : > { %738 = vtanh.f32 %v431_v8 }
  0xfa   : > { %740 = vtanh.f32 %v424_v6 }
  0xfb   : > { %v727_v9 = vpop.eup %726 }
  0xfc   : > { %v441_v30 = vadd.f32 1.0, %v727_v9 }
  0xfd   : > { %v729_v10 = vpop.eup %728 }
  0xfe   : > { %v442_v27 = vadd.f32 1.0, %v729_v10  ;;  %v449_v40 = vmul.f32 0.5, %v441_v30 }
 0x100   : > { %v731_v11 = vpop.eup %730  ;;  %v450_v37 = vmul.f32 0.5, %v442_v27  ;;  %v457_v45 = vmul.f32 %v449_v40, %v940_v18 }
 0x101   : > { %v444_v20 = vadd.f32 1.0, %v731_v11 }
 0x102   : > { %v733_v12 = vpop.eup %732  ;;  %v458_v44 = vmul.f32 %v450_v37, %v946_v22 }
 0x103   : > { %v735_v13 = vpop.eup %734  ;;  %v445_v15 = vadd.f32 1.0, %v733_v12  ;;  %v452_v31 = vmul.f32 0.5, %v444_v20 }
 0x104   : > { %v443_v24 = vadd.f32 1.0, %v735_v13 }
 0x105   : > { %v737_v14 = vpop.eup %736  ;;  %v453_v29 = vmul.f32 0.5, %v445_v15  ;;  %v460_v41 = vmul.f32 %v452_v31, %v958_v33  ;;  %v469_v33 = vpop.permute.xlu0 %468 }
 0x106   : > { %v739_v16 = vpop.eup %738  ;;  %v446_v17 = vadd.f32 1.0, %v737_v14  ;;  %v451_v35 = vmul.f32 0.5, %v443_v24 }
 0x107   : > { %v741_v21 = vpop.eup %740  ;;  %v447_v23 = vadd.f32 1.0, %v739_v16  ;;  %v461_v38 = vmul.f32 %v453_v29, %v964_v39  ;;  %v464_v39 = vld [vmem:[%s1027_s3] sm:$0xf] }
 0x108   : > { %v454_v25 = vmul.f32 0.5, %v446_v17  ;;  %v440_v32 = vadd.f32 1.0, %v741_v21  ;;  %v459_v43 = vmul.f32 %v451_v35, %v951_v26 }
 0x109   : > { %v455_v28 = vmul.f32 0.5, %v447_v23 }
 0x10a   : > { %v462_v36 = vmul.f32 %v454_v25, %v388_v46  ;;  %v448_v42 = vmul.f32 0.5, %v440_v32 }
 0x10b   : > { %v463_v34 = vmul.f32 %v455_v28, %v390_v48 }
 0x10c   : > { %v456_v46 = vmul.f32 %v448_v42, %v942_v19 }
 0x10d   : > { %499 = vmatprep.subr.mxu1 %v463_v34 }
 0x10e   : > { %500 = vmatpush1.msra.mxu1 %v462_v36 }
 0x10f   : > { %501 = vmatprep.subr.mxu1 %v461_v38 }
 0x110   : > { %502 = vmatpush1.msra.mxu1 %v460_v41 }
 0x111   : > { %503 = vmatprep.subr.mxu1 %v459_v43 }
 0x112   : > { %504 = vmatpush1.msra.mxu1 %v458_v44 }
 0x113   : > { %505 = vmatprep.subr.mxu1 %v457_v45 }
 0x114   : > { %506 = vmatpush1.msra.mxu1 %v456_v46 }
 0x115   : > { %658 = vmatmul.mubr.msk.f32.vlgmr.msra.gmra.mxu1 %vm471_vm2, %v464_v39 }
 0x1d5   : > { %v541_v26 = vpop.f32.mrf.mxu1 }
 0x1d6   : > { %v542_v18 = vadd.f32 %v541_v26, %v469_v33 }
 0x1d7   : > { %v543_v22 = vpop.f32.mrf.mxu1 }
 0x1d8   : > { %v544_v47 = vadd.f32 %v543_v22, %v469_v33 }
 0x1da   : > { %v548_v19 = vcombine.low %v542_v18, %v544_v47 }
 0x1dc   : > { %550 = vst [vmem:[%s242_s27] sm:$0xff] %v548_v19 }
 0x1dd   : > { %755 = shalt.err (!%p752_p5)
}
 0x1de   : > { %s756_s14 = scalar_lea.hbm %s566_s9, 128  ;;  %s760_s17 = scalar_lea.hbm %s1029_s5, 256 }
 0x1df   : > { %p757_p6 = scmp.ne.s32.totalorder %s566_s9, %s756_s14  ;;  %p761_p10 = scmp.lt.s32.totalorder %s566_s9, %s1029_s5 }
 0x1e0   : > { %p762_p11 = scmp.lt.s32.totalorder %s760_s17, %s756_s14 }
 0x1e1   : > { %p758_p7 = pnand %p757_p6, %p893_p4 }
 0x1e2   : > { %p763_p12 = por %p762_p11, %p761_p10 }
 0x1e3   : > { %p759_p9 = pneg %p758_p7 }
 0x1e5   : > { %p764_p13 = pnand %p763_p12, %p759_p9 }
 0x1e7   : > { %767 = shalt.err (!%p764_p13)
}
 0x1e8   : > { %666 = dma.vmem_to_hbm [thread:$0]  (%p893_p4), %s569_s29, 128, %s566_s9, %s552_s10  }
 0x1e9 PF: > { %p672_p0 = scmp.ge.s32.totalorder %s818_s23, 2  ;;  %s580_s27 = sand.u32 1, %s798_s18  }
 0x1ea   : > { %s581_s7 = scalar_lea.sflag [#allocation3], %s580_s27 }
 0x1eb   : > { %p669_p1 = pnand %p672_p0, %p900_p8 }
 0x1ed   : > { %p670_p2 = pneg %p669_p1 }
 0x1ef   : > { %793 = dma.done.wait (%p670_p2), %s581_s7, 128  }
 0x1f0   : > { %795 = vsyncadd (%p670_p2), %s581_s7, 4294967168  ;;  %s18_s23 = sadd.s32 1, %s818_s23   ;;  %s1032_s18 = smov %s802_s19 }
 0x1f1   : > { %p15_p3 = scmp.ge.s32.totalorder %s18_s23, 4   ;;  %s1033_s19 = smov %s806_s20 }
 0x1f2   : > { %s1034_s20 = smov %s906_s6  ;;  %s1035_s21 = smov %s814_s22 }
 0x1f3   : > { %s1036_s22 = smov %s1038_s26  ;;  %17 = sbr.rel (!%p15_p3) target bundleno = 4 (0x4), region = 75 }
 0x1f8   :  { %586 = vsyncpa [#allocation3], 1 }
 0x1f9   :  { %588 = vsyncpa [#allocation3 + $0x1], 1 }

</bundles_post_ra>
